<compile_context>
chip_gen: v5e
topology: v5e:2x2
jax: 0.10.0
libtpu: 0.0.40
codegen_flags: <defaults>
</compile_context>

<pallas_src>
import functools

import jax
import jax.numpy as jnp
from jax.experimental import pallas as pl
from jax.experimental.pallas import tpu as pltpu


_LANE = 128
_SUBLANE = 8
# Live-VMEM budget used to SIZE the batch tile (conservative for v7x: 64 MiB
# physical VMEM, 32 MiB default scoped limit).
_VMEM_TILE_BUDGET = 24 * 1024 * 1024
# Explicit scoped-VMEM limit handed to Mosaic: ~2x headroom over the sizing
# budget, still well under v7x's 64 MiB physical VMEM (v5e/v6e have 128 MiB).
_VMEM_LIMIT_BYTES = 48 * 1024 * 1024


def _round_up(n, m):
    return ((n + m - 1) // m) * m


def _round_down(n, m):
    return (n // m) * m


def _pick_batch_tile(B, D, block_b):
    """Pick the batch-tile row count.

    As large as the VMEM budget allows (amortizes the ~0.35 us per-grid-step
    overhead), capped at the requested block_b, capped so the grid keeps >= 2
    steps for v7x's two TensorCores when there is enough work, and 128-row
    aligned (which also satisfies v5e's 16-row bf16 sublane packing).
    """
    if B <= _SUBLANE:
        # Block equals the full batch dim -> sublane-divisibility rule is waived.
        return max(B, 1)
    d_pad = _round_up(max(D, _LANE), _LANE)
    per_row = (2 * 2 * d_pad          # double-buffered bf16 x tile (lane-padded)
               + 4 * _LANE * 3        # f32 h1 / h2 / layer-3 column intermediates
               + 2 * _LANE * 2        # bf16 casts feeding the MXU
               + 4 * _LANE * 2)       # headroom: compiler temps / output relayout
    tb = min(_VMEM_TILE_BUDGET // per_row, block_b, _round_down(B, _SUBLANE))
    if B >= 4096:                     # enough rows: guarantee >= 2 grid steps (megacore)
        tb = min(tb, _round_up(-(-B // 2), _LANE))
    if tb >= _LANE:
        tb = _round_down(tb, _LANE)
    else:
        tb = max(_SUBLANE, _round_down(tb, _SUBLANE))
    return tb


def _mlp_kernel(x_ref, w1_ref, b1_ref, w2_ref, b2_ref, w3_ref, b3_ref, o_ref):
    f32 = jnp.float32
    # Layer 1: (tb, D) @ (D, 64) on the MXU, f32 accumulation; bias/ReLU in f32.
    h1 = jnp.dot(x_ref[...], w1_ref[...], preferred_element_type=f32)
    h1 = jnp.maximum(h1 + b1_ref[...], 0.0)
    # Layer 2: (tb, 64) @ (64, 32); feed the MXU its native narrow dtype.
    h2 = jnp.dot(h1.astype(w2_ref.dtype), w2_ref[...], preferred_element_type=f32)
    h2 = jnp.maximum(h2 + b2_ref[...], 0.0)
    # Layer 3: (tb, 32) @ (32, 1) on the MXU (same fixed pass cost as any N<=256,
    # cheaper than a cross-lane VPU reduce).  Result is a (tb, 1) column.
    y = jnp.dot(h2.astype(w3_ref.dtype), w3_ref[...], preferred_element_type=f32)
    y = y + b3_ref[...]
    # Lane-dense store: one small relayout (tb,1)->(1,tb) so the output block is
    # a contiguous 128-lane-wide row instead of tb/8 single-lane masked stores.
    o_ref[...] = jnp.transpose(y).astype(o_ref.dtype)


@functools.partial(jax.jit, static_argnames=("block_b",))
def mlp_forward(x, w1, b1, w2, b2, w3, b3, *, block_b=8192):
    """Fused MLP forward.

    x:  (B, D)             activations (bf16 preferred, f32 also fine)
    w1: (D, 64)   b1: (1, 64)     # all weights stored (in, out), i.e. transposed
    w2: (64, 32)  b2: (1, 32)     #   vs. PyTorch so the matmuls need no transpose
    w3: (32, 1)   b3: (1, 1)
    Returns (B, 1) float32.
    """
    B, D = x.shape
    H1 = w1.shape[1]
    H2 = w2.shape[1]

    tb = _pick_batch_tile(B, D, block_b)
    num_steps = -(-B // tb)  # cdiv; last x block may be partial (masked/garbage rows)

    param_bytes = sum(a.size * a.dtype.itemsize for a in (w1, b1, w2, b2, w3, b3))
    cost = pl.CostEstimate(
        flops=2 * B * (D * H1 + H1 * H2 + H2),
        transcendentals=0,
        bytes_accessed=x.size * x.dtype.itemsize + param_bytes + num_steps * tb * 4,
    )

    out_rows = pl.pallas_call(
        _mlp_kernel,
        out_shape=jax.ShapeDtypeStruct((num_steps, tb), jnp.float32),
        grid_spec=pltpu.PrefetchScalarGridSpec(
            num_scalar_prefetch=0,
            grid=(num_steps,),
            in_specs=[
                pl.BlockSpec((tb, D), lambda i: (i, 0)),    # x tile (streamed)
                pl.BlockSpec((D, H1), lambda i: (0, 0)),    # w1 (resident)
                pl.BlockSpec((1, H1), lambda i: (0, 0)),    # b1
                pl.BlockSpec((H1, H2), lambda i: (0, 0)),   # w2
                pl.BlockSpec((1, H2), lambda i: (0, 0)),    # b2
                pl.BlockSpec((H2, 1), lambda i: (0, 0)),    # w3
                pl.BlockSpec((1, 1), lambda i: (0, 0)),     # b3
            ],
            out_specs=pl.BlockSpec((1, tb), lambda i: (i, 0)),  # lane-dense row
        ),
        compiler_params=pltpu.CompilerParams(
            dimension_semantics=("parallel",),       # shards steps across v7x TCs
            vmem_limit_bytes=_VMEM_LIMIT_BYTES,
        ),
        cost_estimate=cost,
    )(x, w1, b1, w2, b2, w3, b3)

    # (num_steps, tb) row-major == batch order; drop the <tb garbage tail rows.
    return out_rows.reshape(-1)[:B].reshape(B, 1)


def init_mlp_params(key, encoded_shape, *, matmul_dtype=jnp.bfloat16):
    """Deterministic init matching nn.Linear shapes, stored in (in, out) layout.

    Uniform (-1/sqrt(fan_in), 1/sqrt(fan_in)) init, same scale as PyTorch's
    default.  Matmul weights stored in `matmul_dtype` (bf16); biases stay f32.
    """
    dims = [(encoded_shape, 64), (64, 32), (32, 1)]
    params = []
    for fan_in, fan_out in dims:
        key, kw, kb = jax.random.split(key, 3)
        bound = 1.0 / (fan_in ** 0.5)
        w = jax.random.uniform(kw, (fan_in, fan_out), jnp.float32, -bound, bound)
        b = jax.random.uniform(kb, (1, fan_out), jnp.float32, -bound, bound)
        params += [w.astype(matmul_dtype), b]
    return params


def mlp_reference(x, w1, b1, w2, b2, w3, b3):
    """Pure-JAX reference mirroring the kernel's exact dtype path."""
    f32 = jnp.float32
    h1 = jnp.maximum(jnp.dot(x, w1, preferred_element_type=f32) + b1, 0.0)
    h2 = jnp.maximum(jnp.dot(h1.astype(w2.dtype), w2, preferred_element_type=f32) + b2, 0.0)
    return jnp.dot(h2.astype(w3.dtype), w3, preferred_element_type=f32) + b3


if __name__ == "__main__":
    encoded_shape = 32  # in_features of the first Linear
    batch = 8           # small demo batch

    key = jax.random.PRNGKey(0)
    key, kx = jax.random.split(key)
    x = jax.random.normal(kx, (batch, encoded_shape), jnp.float32).astype(jnp.bfloat16)

    params = init_mlp_params(key, encoded_shape)

    out = jax.block_until_ready(mlp_forward(x, *params))
    ref = mlp_reference(x, *params)
    assert out.shape == (batch, 1), out.shape
    assert jnp.allclose(out, ref, atol=1e-3, rtol=1e-3), "mismatch vs reference"

    # Second check: batch not a multiple of the tile -> exercises the partial
    # final x block (no padding) and a multi-step grid.
    key, kx2 = jax.random.split(key)
    x2 = jax.random.normal(kx2, (1000, encoded_shape), jnp.float32).astype(jnp.bfloat16)
    out2 = jax.block_until_ready(mlp_forward(x2, *params, block_b=256))
    ref2 = mlp_reference(x2, *params)
    assert out2.shape == (1000, 1), out2.shape
    assert jnp.allclose(out2, ref2, atol=1e-3, rtol=1e-3), "mismatch vs reference (partial block)"

    print("KERNEL_OK")
</pallas_src>

<mosaic_0001>
module attributes {stable_mosaic.version = 11 : i64} {
  func.func @_mlp_kernel(%arg0: i32, %arg1: memref<8x32xbf16, #tpu.memory_space<vmem>>, %arg2: memref<32x64xbf16, #tpu.memory_space<vmem>>, %arg3: memref<1x64xf32, #tpu.memory_space<vmem>>, %arg4: memref<64x32xbf16, #tpu.memory_space<vmem>>, %arg5: memref<1x32xf32, #tpu.memory_space<vmem>>, %arg6: memref<32x1xbf16, #tpu.memory_space<vmem>>, %arg7: memref<1x1xf32, #tpu.memory_space<vmem>>, %arg8: memref<1x8xf32, #tpu.memory_space<vmem>>) attributes {dimension_semantics = [#tpu.dimension_semantics<parallel>], iteration_bounds = array<i64: 1>, scalar_prefetch = 0 : i64, scratch_operands = 0 : i64, tpu.core_type = #tpu.core_type<tc>, window_params = [{transform_indices = @transform_0, window_bounds = array<i64: 8, 32>}, {pipeline_mode = #tpu.pipeline_mode<synchronous>, transform_indices = @transform_1, window_bounds = array<i64: 32, 64>}, {pipeline_mode = #tpu.pipeline_mode<synchronous>, transform_indices = @transform_2, window_bounds = array<i64: 1, 64>}, {pipeline_mode = #tpu.pipeline_mode<synchronous>, transform_indices = @transform_3, window_bounds = array<i64: 64, 32>}, {pipeline_mode = #tpu.pipeline_mode<synchronous>, transform_indices = @transform_4, window_bounds = array<i64: 1, 32>}, {pipeline_mode = #tpu.pipeline_mode<synchronous>, transform_indices = @transform_5, window_bounds = array<i64: 32, 1>}, {pipeline_mode = #tpu.pipeline_mode<synchronous>, transform_indices = @transform_6, window_bounds = array<i64: 1, 1>}, {transform_indices = @transform_7, window_bounds = array<i64: 1, 8>}]} {
    %c0 = arith.constant 0 : index
    %c0_0 = arith.constant 0 : index
    %0 = vector.load %arg1[%c0, %c0_0] : memref<8x32xbf16, #tpu.memory_space<vmem>>, vector<8x32xbf16>
    %c0_1 = arith.constant 0 : index
    %c0_2 = arith.constant 0 : index
    %1 = vector.load %arg2[%c0_1, %c0_2] : memref<32x64xbf16, #tpu.memory_space<vmem>>, vector<32x64xbf16>
    %cst = arith.constant dense<0.000000e+00> : vector<8x64xf32>
    %2 = tpu.matmul %0, %1, %cst {dimension_numbers = #tpu.dot_dimension_numbers<[1], [0], [0], [1], [0, 0, 1, 1], [], []>} : vector<8x32xbf16>, vector<32x64xbf16>, vector<8x64xf32> -> vector<8x64xf32>
    %c0_3 = arith.constant 0 : index
    %c0_4 = arith.constant 0 : index
    %3 = vector.load %arg3[%c0_3, %c0_4] : memref<1x64xf32, #tpu.memory_space<vmem>>, vector<1x64xf32>
    %4 = vector.broadcast %3 : vector<1x64xf32> to vector<8x64xf32>
    %5 = arith.addf %2, %4 : vector<8x64xf32>
    %cst_5 = arith.constant 0.000000e+00 : f32
    %6 = vector.broadcast %cst_5 : f32 to vector<8x64xf32>
    %7 = arith.maximumf %5, %6 : vector<8x64xf32>
    %8 = arith.truncf %7 : vector<8x64xf32> to vector<8x64xbf16>
    %c0_6 = arith.constant 0 : index
    %c0_7 = arith.constant 0 : index
    %9 = vector.load %arg4[%c0_6, %c0_7] : memref<64x32xbf16, #tpu.memory_space<vmem>>, vector<64x32xbf16>
    %cst_8 = arith.constant dense<0.000000e+00> : vector<8x32xf32>
    %10 = tpu.matmul %8, %9, %cst_8 {dimension_numbers = #tpu.dot_dimension_numbers<[1], [0], [0], [1], [0, 0, 1, 1], [], []>} : vector<8x64xbf16>, vector<64x32xbf16>, vector<8x32xf32> -> vector<8x32xf32>
    %c0_9 = arith.constant 0 : index
    %c0_10 = arith.constant 0 : index
    %11 = vector.load %arg5[%c0_9, %c0_10] : memref<1x32xf32, #tpu.memory_space<vmem>>, vector<1x32xf32>
    %12 = vector.broadcast %11 : vector<1x32xf32> to vector<8x32xf32>
    %13 = arith.addf %10, %12 : vector<8x32xf32>
    %cst_11 = arith.constant 0.000000e+00 : f32
    %14 = vector.broadcast %cst_11 : f32 to vector<8x32xf32>
    %15 = arith.maximumf %13, %14 : vector<8x32xf32>
    %16 = arith.truncf %15 : vector<8x32xf32> to vector<8x32xbf16>
    %c0_12 = arith.constant 0 : index
    %c0_13 = arith.constant 0 : index
    %17 = vector.load %arg6[%c0_12, %c0_13] : memref<32x1xbf16, #tpu.memory_space<vmem>>, vector<32x1xbf16>
    %cst_14 = arith.constant dense<0.000000e+00> : vector<8x1xf32>
    %18 = tpu.matmul %16, %17, %cst_14 {dimension_numbers = #tpu.dot_dimension_numbers<[1], [0], [0], [1], [0, 0, 1, 1], [], []>} : vector<8x32xbf16>, vector<32x1xbf16>, vector<8x1xf32> -> vector<8x1xf32>
    %c0_15 = arith.constant 0 : index
    %c0_16 = arith.constant 0 : index
    %19 = vector.load %arg7[%c0_15, %c0_16] : memref<1x1xf32, #tpu.memory_space<vmem>>, vector<1x1xf32>
    %20 = vector.broadcast %19 : vector<1x1xf32> to vector<8x1xf32>
    %21 = arith.addf %18, %20 : vector<8x1xf32>
    %22 = tpu.transpose %21, [1, 0] : vector<8x1xf32> -> vector<1x8xf32>
    %c0_17 = arith.constant 0 : index
    %c0_18 = arith.constant 0 : index
    %23 = vector.load %arg8[%c0_17, %c0_18] : memref<1x8xf32, #tpu.memory_space<vmem>>, vector<1x8xf32>
    tpu.vector_store %arg8[%c0_17, %c0_18], %22 {strides = array<i32>} : memref<1x8xf32, #tpu.memory_space<vmem>>, vector<1x8xf32>,
    return
  }
  func.func @transform_0(%arg0: i32) -> (i32, i32) {
    %c0_i32 = arith.constant 0 : i32
    %c0_i32_0 = arith.constant 0 : i32
    return %arg0, %c0_i32 : i32, i32
  }
  func.func @transform_1(%arg0: i32) -> (i32, i32) {
    %c0_i32 = arith.constant 0 : i32
    %c0_i32_0 = arith.constant 0 : i32
    %c0_i32_1 = arith.constant 0 : i32
    return %c0_i32, %c0_i32_0 : i32, i32
  }
  func.func @transform_2(%arg0: i32) -> (i32, i32) {
    %c0_i32 = arith.constant 0 : i32
    %c0_i32_0 = arith.constant 0 : i32
    %c0_i32_1 = arith.constant 0 : i32
    return %c0_i32, %c0_i32_0 : i32, i32
  }
  func.func @transform_3(%arg0: i32) -> (i32, i32) {
    %c0_i32 = arith.constant 0 : i32
    %c0_i32_0 = arith.constant 0 : i32
    %c0_i32_1 = arith.constant 0 : i32
    return %c0_i32, %c0_i32_0 : i32, i32
  }
  func.func @transform_4(%arg0: i32) -> (i32, i32) {
    %c0_i32 = arith.constant 0 : i32
    %c0_i32_0 = arith.constant 0 : i32
    %c0_i32_1 = arith.constant 0 : i32
    return %c0_i32, %c0_i32_0 : i32, i32
  }
  func.func @transform_5(%arg0: i32) -> (i32, i32) {
    %c0_i32 = arith.constant 0 : i32
    %c0_i32_0 = arith.constant 0 : i32
    %c0_i32_1 = arith.constant 0 : i32
    return %c0_i32, %c0_i32_0 : i32, i32
  }
  func.func @transform_6(%arg0: i32) -> (i32, i32) {
    %c0_i32 = arith.constant 0 : i32
    %c0_i32_0 = arith.constant 0 : i32
    %c0_i32_1 = arith.constant 0 : i32
    return %c0_i32, %c0_i32_0 : i32, i32
  }
  func.func @transform_7(%arg0: i32) -> (i32, i32) {
    %c0_i32 = arith.constant 0 : i32
    %c0_i32_0 = arith.constant 0 : i32
    return %arg0, %c0_i32 : i32, i32
  }
}

</mosaic_0001>

<bundles_post_ra>
// kernel: mlp_forward.1
= control target key start
LH: loop header
LB: loop body
LE: loop exit
PB: predicated region body
PF: predicated region fallthrough
CT: control target
= control target key end

     0   :  { %s367_s0 = inlined_call_operand.vmem [shape: bf16[8,32], index: 0, kind: input, shape index: {}]   ;;  %s368_s1 = inlined_call_operand.vmem [shape: bf16[32,64], index: 1, kind: input, shape index: {}]   ;;  %s369_s2 = inlined_call_operand.vmem [shape: f32[1,64], index: 2, kind: input, shape index: {}]   ;;  %s370_s3 = inlined_call_operand.vmem [shape: bf16[64,32], index: 3, kind: input, shape index: {}]   ;;  %s371_s4 = inlined_call_operand.vmem [shape: f32[1,32], index: 4, kind: input, shape index: {}]   ;;  %s372_s5 = inlined_call_operand.vmem [shape: bf16[32,1], index: 5, kind: input, shape index: {}]   ;;  %s373_s6 = inlined_call_operand.<no memory space> [shape: f32[1,1], index: 6, kind: input, shape index: {}]   ;;  %s374_s7 = inlined_call_operand.hbm [shape: f32[1,8], index: 7, kind: output, shape index: {}]  }
   0x1   :  { %v12_v0 = vstv %s373_s6 }
   0x2   :  { %13 = vst [vmem:[#allocation2] sm:$0x1] %v12_v0 }
   0x3   :  { %v247_v1 = vld [vmem:[%s368_s1 + $0x8] sm:$0xff]  ;;  %v251_v2 = vld [vmem:[%s370_s3 + $0x18] sm:$0xff]  ;;  %v246_v3 = vld [vmem:[%s368_s1] sm:$0xff] }
   0x4   :  { %61 = vmatpush.bf16.msra.mxu0 %v247_v1  ;;  %114 = vmatpush.bf16.msra.mxu1 %v251_v2  ;;  %v250_v4 = vld [vmem:[%s370_s3 + $0x10] sm:$0xff] }
   0x5   :  { %14 = vsyncpa [#allocation4], 0  ;;  %v30_v5 = vld [vmem:[%s367_s0] sm:$0xf]  ;;  %vm51_vm0 = vcmask 261120   ;;  %v249_v6 = vld [vmem:[%s370_s3 + $0x8] sm:$0xff] }
   0x6   :  { %v248_v7 = vld [vmem:[%s370_s3] sm:$0xff]  ;;  %vm106_vm1 = vcmask 523264   ;;  %v253_v14 = vld [vmem:[%s372_s5 + $0x8] sm:$0xff]  ;;  %s202_s23 = sshll.u32 %s374_s7, 4  ;;  %vm193_vm2 = vcmask 57344   ;;  %s203_s23 = int_to_ptr.hbm [resolvable:$true] %s202_s23 }
   0x7   :  { %v256_v8 = vld [vmem:[%s369_s2] ss:$0 sm:$0xff]  ;;  %154 = vmatpush.bf16.msra.mxu2 %v253_v14  ;;  %s285_s2 = smov [#allocation3]  }
   0x8   :  { %62 = vmatpush.bf16.msra.mxu0 %v246_v3  ;;  %115 = vmatpush.bf16.msra.mxu1 %v250_v4  ;;  %v252_v15 = vld [vmem:[%s372_s5] sm:$0xff]  ;;  %s200_s21 = sshll.u32 %s285_s2, 4  ;;  %s201_s21 = int_to_ptr.vmem [resolvable:$true] %s200_s21 }
   0x9   :  { %v257_v16 = vld [vmem:[%s371_s4] ss:$0 sm:$0xff] }
   0xa   :  { %v258_v22 = vld [vmem:[#allocation2] ss:$0 sm:$0xff] }
   0xb   :  { %219 = vmatmul.msk.bf16.vlgmr.msra.gmra.mxu0 %vm51_vm0, %v30_v5  ;;  %155 = vmatpush.bf16.msra.mxu2 %v252_v15 }
   0xc   :  { %116 = vmatpush.bf16.msra.mxu1 %v249_v6 }
  0x10   :  { %117 = vmatpush.bf16.msra.mxu1 %v248_v7 }
  0x88   :  { %v64_v9 = vpop.f32.mrf.mxu0 }
  0x89   :  { %v65_v10 = vadd.f32 %v256_v8, %v64_v9 }
  0x8b   :  { %v68_v11 = vmax.f32 %v65_v10, 0.0 }
  0x8d   :  { %v69_v12 = vpack.c.bf16 %v68_v11, %v68_v11 }
  0x8f   :  { %236 = vmatmul.msk.bf16.vlgmr.msra.gmra.mxu1 %vm106_vm1, %v69_v12 }
  0x90   :  { %v66_v13 = vpop.f32.mrf.mxu0 }
 0x10c   :  { %v119_v17 = vpop.f32.mrf.mxu1 }
 0x10d   :  { %v120_v18 = vadd.f32 %v257_v16, %v119_v17 }
 0x10f   :  { %v123_v19 = vmax.f32 %v120_v18, 0.0 }
 0x111   :  { %v124_v20 = vpack.c.bf16 %v123_v19, %v123_v19 }
 0x113   :  { %245 = vmatmul.msk.bf16.vlgmr.msra.gmra.mxu2 %vm51_vm0, %v124_v20 }
 0x114   :  { %v121_v21 = vpop.f32.mrf.mxu1 }
 0x196   :  { %v157_v23 = vpop.f32.mrf.mxu2 }
 0x197   :  { %v158_v24 = vadd.f32 %v258_v22, %v157_v23 }
 0x199   :  { %161 = vxpose.xlu0.b32.start.end [1/1] (short) (narrow) %v158_v24, 8 }
 0x19e   :  { %v159_v25 = vpop.f32.mrf.mxu2 }
 0x23d   :  { %v177_v26 = vpop.trf.xlu0 }
 0x23e   :  { %194 = vst.msk [vmem:[#allocation3] sm:$0x1] %vm193_vm2, %v177_v26 }
 0x23f   :  { %205 = dma.vmem_to_hbm [thread:$0]  %s201_s21, 16, %s203_s23, [#allocation4]  }
 0x240   :  { %283 = dma.done.wait [#allocation4], 16  }
 0x241   :  { %284 = vsyncadd [#allocation4], 4294967280 }
 0x242   :  { %210 = vsyncpa [#allocation4], 1 }

</bundles_post_ra>
